<compile_context>
chip_gen: v6e
topology: v6e:2x2x1
jax: 0.10.0
libtpu: 0.0.40
codegen_flags: <defaults>
</compile_context>

<pallas_src>
import functools

import jax
import jax.numpy as jnp
from jax import lax
from jax.experimental import pallas as pl
from jax.experimental.pallas import tpu as pltpu


def _round_up(x, m):
    return (x + m - 1) // m * m


def _vq_kernel(x_ref, eaug_ref, et_ref, q_ref, sse_ref, *,
               hw, tile_hw, k_total, k_chunk, use_vpu_scores):
    """One grid step: one batch element x one spatial tile.

    x_ref:    (1, D, T)       f32        latent tile (NCHW-native: columns = vectors)
    eaug_ref: (K, D+1)        f32/bf16   augmented codebook [-2*e | ||e||^2]
    et_ref:   (D, K)          f32        codebook transposed (exact gather)
    q_ref:    (1, D, T)       f32        quantized tile (output)
    sse_ref:  (1, 1, 8, 128)  f32        per-tile partial sum of squared errors
    """
    x = x_ref[0]                                   # (D, T) f32
    d = x.shape[0]
    thw = x.shape[1]

    n_chunks = pl.cdiv(k_total, k_chunk)           # static python int

    if not use_vpu_scores:
        # Append a constant ones row so dist = e_aug @ x_aug comes straight
        # out of the MXU (e_sq - 2<e,x> folded into one contraction).
        x_mm = x.astype(eaug_ref.dtype)
        ones = jnp.ones((1, thw), dtype=eaug_ref.dtype)
        x_aug = jnp.concatenate([x_mm, ones], axis=0)          # (D+1, T)

    # ---- Pass 1: streaming argmin over codebook chunks -------------------
    min_d = jnp.full((1, thw), jnp.inf, dtype=jnp.float32)
    best = jnp.zeros((1, thw), dtype=jnp.int32)
    for c in range(n_chunks):
        off = c * k_chunk
        kc = min(k_chunk, k_total - off)
        e_aug_c = eaug_ref[pl.ds(off, kc), :]                  # (kc, D+1)
        if use_vpu_scores:
            # Small-D fast path: unrolled VPU FMA over D plus the ||e||^2
            # column; avoids a nearly-idle MXU contraction for tiny D.
            dist = jnp.broadcast_to(
                e_aug_c[:, d:d + 1].astype(jnp.float32), (kc, thw))
            for dd in range(d):
                dist = dist + (e_aug_c[:, dd:dd + 1].astype(jnp.float32)
                               * x[dd:dd + 1, :])
        else:
            dist = jnp.dot(e_aug_c, x_aug,
                           preferred_element_type=jnp.float32)  # (kc, T)
        iota_k = lax.broadcasted_iota(jnp.int32, (kc, thw), 0) + off
        cmin = jnp.min(dist, axis=0, keepdims=True)             # (1, T)
        cand = jnp.min(jnp.where(dist == cmin, iota_k, k_total),
                       axis=0, keepdims=True)                   # (1, T)
        take = cmin < min_d      # strict < keeps first occurrence across chunks
        best = jnp.where(take, cand, best)
        min_d = jnp.where(take, cmin, min_d)

    # ---- Pass 2: gather winning codebook rows (one-hot matmul, chunked) ---
    # Kept in f32 so quantized columns are exact codebook rows.
    quantized = jnp.zeros((d, thw), dtype=jnp.float32)
    for c in range(n_chunks):
        off = c * k_chunk
        kc = min(k_chunk, k_total - off)
        e_t_c = et_ref[:, pl.ds(off, kc)]                       # (D, kc)
        iota_k = lax.broadcasted_iota(jnp.int32, (kc, thw), 0) + off
        one_hot = (iota_k == best).astype(jnp.float32)          # (kc, T)
        quantized = quantized + jnp.dot(e_t_c, one_hot,
                                        preferred_element_type=jnp.float32)

    q_ref[0] = quantized

    # Partial SSE; mask spatial columns past the ragged edge (no host-side
    # padding — Pallas clips OOB output writes, this mask keeps garbage edge
    # columns out of the loss reduction).
    diff = quantized - x
    t_idx = pl.program_id(1)
    col = t_idx * tile_hw + lax.broadcasted_iota(jnp.int32, (1, thw), 1)
    diff_sq = jnp.where(col < hw, diff * diff, 0.0)
    sse_ref[...] = jnp.broadcast_to(jnp.sum(diff_sq), sse_ref.shape)


def _vmem_estimate(d, k, t_hw, k_chunk, e_bytes):
    """Rough VMEM footprint (bytes) incl. lane/sublane padding + live temps."""
    pad8 = lambda v: _round_up(max(int(v), 1), 8)
    pad128 = lambda v: _round_up(max(int(v), 1), 128)
    xq = 2 * 2 * pad8(d) * t_hw * 4                 # x & q tiles, double-buffered
    sse = 2 * 8 * 128 * 4
    e_aug = 2 * pad8(k) * pad128(d + 1) * e_bytes   # augmented codebook
    e_t = 2 * pad8(d) * pad128(k) * 4               # transposed codebook
    kc = min(k_chunk, k)
    temps = 5 * pad8(kc) * t_hw * 4                 # dist/one_hot/iota/cmp/aug temps
    return xq + sse + e_aug + e_t + temps


@functools.partial(jax.jit,
                   static_argnames=("beta", "tile_hw", "k_chunk",
                                    "bf16_distances"))
def vector_quantizer_forward(latents_nchw, embedding, *, beta=0.25,
                             tile_hw=1024, k_chunk=1024,
                             bf16_distances=False):
    """Forward pass of VectorQuantizer.

    latents_nchw: (B, D, H, W) float32
    embedding:    (K, D)       float32 codebook
    Returns (quantized NCHW, vq_loss) — forward values only; detach() /
    straight-through estimator only affect gradients, so the forward value of
    the quantized output is simply the codebook lookup.
    """
    B, D, H, W = latents_nchw.shape
    K = embedding.shape[0]
    hw = H * W

    # NCHW-native: reshape only (free); no pads, no transposes in HBM.
    x = latents_nchw.reshape(B, D, hw).astype(jnp.float32)

    use_vpu_scores = (D + 1) <= 8
    # bf16 only matters on the MXU path; VPU small-D path stays exact f32.
    score_dtype = (jnp.bfloat16 if (bf16_distances and not use_vpu_scores)
                   else jnp.float32)
    e_bytes = 2 if score_dtype == jnp.bfloat16 else 4

    e = embedding.astype(jnp.float32)
    e_t = jnp.transpose(e)                                   # (D, K) f32, hoisted
    e_sq = jnp.sum(e * e, axis=1, keepdims=True)             # (K, 1), hoisted
    # Augmented codebook [-2*e | ||e||^2]; the score-matmul cast is hoisted
    # out of the kernel (per-step x cast only).
    e_aug = jnp.concatenate([-2.0 * e, e_sq], axis=1).astype(score_dtype)

    # Static K chunk (multiple of 8); only matters for very large codebooks.
    kc = min(_round_up(K, 8), _round_up(int(k_chunk), 8))

    # Generation-aware VMEM budget (v7x: 64 MiB physical; v5e/v6e: 128 MiB).
    try:
        phys_vmem = int(pltpu.get_tpu_info().vmem_capacity_bytes)
    except Exception:
        phys_vmem = 0
    if phys_vmem <= 0:
        phys_vmem = 64 * 1024 * 1024
    vmem_cap = int(0.8 * phys_vmem)

    # Lane-aligned spatial tile; shrink until the estimate fits the budget.
    t_hw = _round_up(min(int(tile_hw), _round_up(hw, 128)), 128)
    while t_hw > 128 and int(1.4 * _vmem_estimate(D, K, t_hw, kc, e_bytes)) > vmem_cap:
        t_hw = max(128, _round_up(t_hw // 2, 128))
    num_t = pl.cdiv(hw, t_hw)

    vmem_est = _vmem_estimate(D, K, t_hw, kc, e_bytes)
    # Always set the limit explicitly (v5e's scoped default is only 16 MiB),
    # clamped to the chip's physical VMEM (critical on v7x).
    vmem_limit = int(min(vmem_cap,
                         max(int(1.4 * vmem_est), 32 * 1024 * 1024)))

    kernel = functools.partial(
        _vq_kernel, hw=hw, tile_hw=t_hw, k_total=K, k_chunk=kc,
        use_vpu_scores=use_vpu_scores)

    q_flat, sse = pl.pallas_call(
        kernel,
        out_shape=(
            jax.ShapeDtypeStruct((B, D, hw), jnp.float32),
            jax.ShapeDtypeStruct((B, num_t, 8, 128), jnp.float32),
        ),
        grid_spec=pltpu.PrefetchScalarGridSpec(
            num_scalar_prefetch=0,
            grid=(B, num_t),
            in_specs=[
                pl.BlockSpec((1, D, t_hw), lambda b, t: (b, 0, t)),      # latents
                pl.BlockSpec((K, D + 1), lambda b, t: (0, 0)),           # [-2e | e^2]
                pl.BlockSpec((D, K), lambda b, t: (0, 0)),               # e^T
            ],
            out_specs=[
                pl.BlockSpec((1, D, t_hw), lambda b, t: (b, 0, t)),      # quantized
                pl.BlockSpec((1, 1, 8, 128), lambda b, t: (b, t, 0, 0)), # partial SSE
            ],
        ),
        compiler_params=pltpu.CompilerParams(
            dimension_semantics=("parallel", "parallel"),
            vmem_limit_bytes=vmem_limit),
    )(x, e_aug, e_t)

    sse_total = jnp.sum(sse[:, :, 0, 0])
    mse = sse_total / jnp.float32(B * hw * D)
    # commitment_loss and embedding_loss have identical forward values;
    # detach() only changes gradient flow.
    vq_loss = mse * beta + mse

    quantized = q_flat.reshape(B, D, H, W)
    return quantized, vq_loss


def _reference(latents_nchw, embedding, beta=0.25):
    """Pure-JAX reference mirroring the PyTorch forward (values only)."""
    B, D, H, W = latents_nchw.shape
    lat = jnp.transpose(latents_nchw, (0, 2, 3, 1))
    flat = lat.reshape(-1, D)
    dist = (jnp.sum(flat ** 2, axis=1, keepdims=True)
            + jnp.sum(embedding ** 2, axis=1)
            - 2.0 * flat @ embedding.T)
    inds = jnp.argmin(dist, axis=1)
    q = embedding[inds].reshape(lat.shape)
    mse = jnp.mean((q - lat) ** 2)
    loss = mse * beta + mse
    return jnp.transpose(q, (0, 3, 1, 2)), loss


if __name__ == "__main__":
    key = jax.random.PRNGKey(0)
    k_lat, k_emb = jax.random.split(key)

    # Primary demo shape (small D exercises the VPU score path).
    B, D, H, W = 2, 4, 16, 16      # D = embedding_dim
    K = 8                          # num_embeddings
    beta = 0.25

    latents = jax.random.normal(k_lat, (B, D, H, W), dtype=jnp.float32)
    # nn.Embedding(K, D) with weight.data.uniform_(-1/K, 1/K)
    embedding = jax.random.uniform(
        k_emb, (K, D), dtype=jnp.float32, minval=-1.0 / K, maxval=1.0 / K)

    quantized, vq_loss = vector_quantizer_forward(latents, embedding, beta=beta)
    quantized = jax.block_until_ready(quantized)
    vq_loss = jax.block_until_ready(vq_loss)

    q_ref, loss_ref = _reference(latents, embedding, beta)
    assert quantized.shape == (B, D, H, W)
    assert jnp.allclose(quantized, q_ref, atol=1e-5, rtol=1e-5)
    assert jnp.allclose(vq_loss, loss_ref, atol=1e-5, rtol=1e-5)

    # Ragged spatial extent (no host-side padding) + MXU augmented-matmul path.
    k_lat2, k_emb2 = jax.random.split(jax.random.PRNGKey(0), 2)
    B2, D2, H2, W2, K2 = 1, 8, 10, 10, 16
    latents2 = jax.random.normal(k_lat2, (B2, D2, H2, W2), dtype=jnp.float32)
    embedding2 = jax.random.uniform(
        k_emb2, (K2, D2), dtype=jnp.float32, minval=-1.0 / K2, maxval=1.0 / K2)
    q2, loss2 = vector_quantizer_forward(latents2, embedding2, beta=beta)
    q2 = jax.block_until_ready(q2)
    q2_ref, loss2_ref = _reference(latents2, embedding2, beta)
    assert q2.shape == (B2, D2, H2, W2)
    assert jnp.allclose(q2, q2_ref, atol=1e-5, rtol=1e-5)
    assert jnp.allclose(loss2, loss2_ref, atol=1e-5, rtol=1e-5)

    # Exercise the K-chunked streaming-argmin path (2 chunks of 8).
    q2c, loss2c = vector_quantizer_forward(latents2, embedding2, beta=beta,
                                           k_chunk=8)
    q2c = jax.block_until_ready(q2c)
    assert jnp.allclose(q2c, q2_ref, atol=1e-5, rtol=1e-5)
    assert jnp.allclose(loss2c, loss2_ref, atol=1e-5, rtol=1e-5)

    # bf16 score fast path (documented fast path for v6e/v7x): argmin may flip
    # on near-ties, so only require the loss to be close.
    q2b, loss2b = vector_quantizer_forward(latents2, embedding2, beta=beta,
                                           bf16_distances=True)
    q2b = jax.block_until_ready(q2b)
    assert q2b.shape == (B2, D2, H2, W2)
    assert jnp.allclose(loss2b, loss2_ref, rtol=5e-2, atol=1e-3)

    print("KERNEL_OK")
</pallas_src>

<mosaic_0001>
module attributes {stable_mosaic.version = 11 : i64} {
  func.func @_vq_kernel(%arg0: i32, %arg1: i32, %arg2: memref<1x4x256xf32, #tpu.memory_space<vmem>>, %arg3: memref<8x5xf32, #tpu.memory_space<vmem>>, %arg4: memref<4x8xf32, #tpu.memory_space<vmem>>, %arg5: memref<1x4x256xf32, #tpu.memory_space<vmem>>, %arg6: memref<1x1x8x128xf32, #tpu.memory_space<vmem>>) attributes {dimension_semantics = [#tpu.dimension_semantics<parallel>, #tpu.dimension_semantics<parallel>], iteration_bounds = array<i64: 2, 1>, scalar_prefetch = 0 : i64, scratch_operands = 0 : i64, tpu.core_type = #tpu.core_type<tc>, window_params = [{transform_indices = @transform_0, window_bounds = array<i64: 1, 4, 256>}, {pipeline_mode = #tpu.pipeline_mode<synchronous>, transform_indices = @transform_1, window_bounds = array<i64: 8, 5>}, {pipeline_mode = #tpu.pipeline_mode<synchronous>, transform_indices = @transform_2, window_bounds = array<i64: 4, 8>}, {transform_indices = @transform_3, window_bounds = array<i64: 1, 4, 256>}, {transform_indices = @transform_4, window_bounds = array<i64: 1, 1, 8, 128>}]} {
    %c0 = arith.constant 0 : index
    %c0_0 = arith.constant 0 : index
    %c0_1 = arith.constant 0 : index
    %0 = vector.load %arg2[%c0, %c0_0, %c0_1] : memref<1x4x256xf32, #tpu.memory_space<vmem>>, vector<1x4x256xf32>
    %1 = vector.shape_cast %0 : vector<1x4x256xf32> to vector<4x256xf32>
    %cst = arith.constant 0x7F800000 : f32
    %2 = vector.broadcast %cst : f32 to vector<1x256xf32>
    %c0_i32 = arith.constant 0 : i32
    %3 = vector.broadcast %c0_i32 : i32 to vector<1x256xi32>
    %c0_2 = arith.constant 0 : index
    %c0_3 = arith.constant 0 : index
    %4 = vector.load %arg3[%c0_2, %c0_3] : memref<8x5xf32, #tpu.memory_space<vmem>>, vector<8x5xf32>
    %5 = vector.extract_strided_slice %4 {offsets = [0, 4], sizes = [8, 1], strides = [1, 1]} : vector<8x5xf32> to vector<8x1xf32>
    %6 = vector.shape_cast %5 : vector<8x1xf32> to vector<8x1xf32>
    %7 = vector.broadcast %6 : vector<8x1xf32> to vector<8x256xf32>
    %8 = vector.extract_strided_slice %4 {offsets = [0, 0], sizes = [8, 1], strides = [1, 1]} : vector<8x5xf32> to vector<8x1xf32>
    %9 = vector.extract_strided_slice %1 {offsets = [0, 0], sizes = [1, 256], strides = [1, 1]} : vector<4x256xf32> to vector<1x256xf32>
    %10 = vector.broadcast %8 : vector<8x1xf32> to vector<8x256xf32>
    %11 = vector.broadcast %9 : vector<1x256xf32> to vector<8x256xf32>
    %12 = arith.mulf %10, %11 : vector<8x256xf32>
    %13 = arith.addf %7, %12 : vector<8x256xf32>
    %14 = vector.extract_strided_slice %4 {offsets = [0, 1], sizes = [8, 1], strides = [1, 1]} : vector<8x5xf32> to vector<8x1xf32>
    %15 = vector.extract_strided_slice %1 {offsets = [1, 0], sizes = [1, 256], strides = [1, 1]} : vector<4x256xf32> to vector<1x256xf32>
    %16 = vector.broadcast %14 : vector<8x1xf32> to vector<8x256xf32>
    %17 = vector.broadcast %15 : vector<1x256xf32> to vector<8x256xf32>
    %18 = arith.mulf %16, %17 : vector<8x256xf32>
    %19 = arith.addf %13, %18 : vector<8x256xf32>
    %20 = vector.extract_strided_slice %4 {offsets = [0, 2], sizes = [8, 1], strides = [1, 1]} : vector<8x5xf32> to vector<8x1xf32>
    %21 = vector.extract_strided_slice %1 {offsets = [2, 0], sizes = [1, 256], strides = [1, 1]} : vector<4x256xf32> to vector<1x256xf32>
    %22 = vector.broadcast %20 : vector<8x1xf32> to vector<8x256xf32>
    %23 = vector.broadcast %21 : vector<1x256xf32> to vector<8x256xf32>
    %24 = arith.mulf %22, %23 : vector<8x256xf32>
    %25 = arith.addf %19, %24 : vector<8x256xf32>
    %26 = vector.extract_strided_slice %4 {offsets = [0, 3], sizes = [8, 1], strides = [1, 1]} : vector<8x5xf32> to vector<8x1xf32>
    %27 = vector.extract_strided_slice %1 {offsets = [3, 0], sizes = [1, 256], strides = [1, 1]} : vector<4x256xf32> to vector<1x256xf32>
    %28 = vector.broadcast %26 : vector<8x1xf32> to vector<8x256xf32>
    %29 = vector.broadcast %27 : vector<1x256xf32> to vector<8x256xf32>
    %30 = arith.mulf %28, %29 : vector<8x256xf32>
    %31 = arith.addf %25, %30 : vector<8x256xf32>
    %32 = tpu.iota {dimensions = array<i32: 0>} : vector<8x256xi32>
    %c0_i32_4 = arith.constant 0 : i32
    %33 = vector.broadcast %c0_i32_4 : i32 to vector<8x256xi32>
    %34 = arith.addi %32, %33 : vector<8x256xi32>
    %cst_5 = arith.constant dense<0x7F800000> : vector<256xf32>
    %35 = vector.multi_reduction <minimumf>, %31, %cst_5 [0] : vector<8x256xf32> to vector<256xf32>
    %36 = vector.shape_cast %35 : vector<256xf32> to vector<1x256xf32>
    %37 = vector.broadcast %36 : vector<1x256xf32> to vector<8x256xf32>
    %38 = arith.cmpf oeq, %31, %37 : vector<8x256xf32>
    %c8_i32 = arith.constant 8 : i32
    %39 = vector.broadcast %c8_i32 : i32 to vector<8x256xi32>
    %40 = arith.select %38, %34, %39 : vector<8x256xi1>, vector<8x256xi32>
    %cst_6 = arith.constant dense<2147483647> : vector<256xi32>
    %41 = vector.multi_reduction <minsi>, %40, %cst_6 [0] : vector<8x256xi32> to vector<256xi32>
    %42 = vector.shape_cast %41 : vector<256xi32> to vector<1x256xi32>
    %43 = arith.cmpf olt, %36, %2 : vector<1x256xf32>
    %44 = arith.select %43, %42, %3 : vector<1x256xi1>, vector<1x256xi32>
    %cst_7 = arith.constant 0.000000e+00 : f32
    %45 = vector.broadcast %cst_7 : f32 to vector<4x256xf32>
    %c0_8 = arith.constant 0 : index
    %c0_9 = arith.constant 0 : index
    %46 = vector.load %arg4[%c0_8, %c0_9] : memref<4x8xf32, #tpu.memory_space<vmem>>, vector<4x8xf32>
    %47 = tpu.iota {dimensions = array<i32: 0>} : vector<8x256xi32>
    %c0_i32_10 = arith.constant 0 : i32
    %48 = vector.broadcast %c0_i32_10 : i32 to vector<8x256xi32>
    %49 = arith.addi %47, %48 : vector<8x256xi32>
    %50 = vector.broadcast %44 : vector<1x256xi32> to vector<8x256xi32>
    %51 = arith.cmpi eq, %49, %50 : vector<8x256xi32>
    %52 = arith.extui %51 : vector<8x256xi1> to vector<8x256xi32>
    %53 = arith.sitofp %52 : vector<8x256xi32> to vector<8x256xf32>
    %cst_11 = arith.constant dense<0.000000e+00> : vector<4x256xf32>
    %54 = tpu.matmul %46, %53, %cst_11 {dimension_numbers = #tpu.dot_dimension_numbers<[1], [0], [0], [1], [0, 0, 1, 1], [], []>} : vector<4x8xf32>, vector<8x256xf32>, vector<4x256xf32> -> vector<4x256xf32>
    %55 = arith.addf %45, %54 : vector<4x256xf32>
    %c0_12 = arith.constant 0 : index
    %c0_13 = arith.constant 0 : index
    %c0_14 = arith.constant 0 : index
    %56 = vector.load %arg5[%c0_12, %c0_13, %c0_14] : memref<1x4x256xf32, #tpu.memory_space<vmem>>, vector<1x4x256xf32>
    %57 = vector.shape_cast %56 : vector<1x4x256xf32> to vector<4x256xf32>
    %58 = vector.shape_cast %55 : vector<4x256xf32> to vector<1x4x256xf32>
    tpu.vector_store %arg5[%c0_12, %c0_13, %c0_14], %58 {strides = array<i32>} : memref<1x4x256xf32, #tpu.memory_space<vmem>>, vector<1x4x256xf32>,
    %59 = arith.subf %55, %1 : vector<4x256xf32>
    %c256_i32 = arith.constant 256 : i32
    %60 = arith.muli %arg1, %c256_i32 : i32
    %61 = tpu.iota {dimensions = array<i32: 1>} : vector<1x256xi32>
    %62 = vector.broadcast %60 : i32 to vector<1x256xi32>
    %63 = arith.addi %62, %61 : vector<1x256xi32>
    %c256_i32_15 = arith.constant 256 : i32
    %64 = vector.broadcast %c256_i32_15 : i32 to vector<1x256xi32>
    %65 = arith.cmpi slt, %63, %64 : vector<1x256xi32>
    %66 = arith.mulf %59, %59 : vector<4x256xf32>
    %cst_16 = arith.constant 0.000000e+00 : f32
    %67 = vector.shape_cast %65 : vector<1x256xi1> to vector<1x256xi1>
    %68 = vector.broadcast %67 : vector<1x256xi1> to vector<4x256xi1>
    %69 = vector.broadcast %cst_16 : f32 to vector<4x256xf32>
    %70 = arith.select %68, %66, %69 : vector<4x256xi1>, vector<4x256xf32>
    %71 = vector.shape_cast %70 : vector<4x256xf32> to vector<1x4x256xf32>
    %cst_17 = arith.constant dense<0.000000e+00> : vector<1xf32>
    %72 = vector.multi_reduction <add>, %71, %cst_17 [1, 2] : vector<1x4x256xf32> to vector<1xf32>
    %73 = vector.shape_cast %72 : vector<1xf32> to vector<1x1x1xf32>
    %74 = vector.extract %73[0, 0, 0] : f32 from vector<1x1x1xf32>
    %75 = vector.broadcast %74 : f32 to vector<1x1x8x128xf32>
    %c0_18 = arith.constant 0 : index
    %c0_19 = arith.constant 0 : index
    %c0_20 = arith.constant 0 : index
    %c0_21 = arith.constant 0 : index
    %76 = vector.load %arg6[%c0_18, %c0_19, %c0_20, %c0_21] : memref<1x1x8x128xf32, #tpu.memory_space<vmem>>, vector<1x1x8x128xf32>
    tpu.vector_store %arg6[%c0_18, %c0_19, %c0_20, %c0_21], %75 {strides = array<i32>} : memref<1x1x8x128xf32, #tpu.memory_space<vmem>>, vector<1x1x8x128xf32>,
    return
  }
  func.func @transform_0(%arg0: i32, %arg1: i32) -> (i32, i32, i32) {
    %c0_i32 = arith.constant 0 : i32
    %c0_i32_0 = arith.constant 0 : i32
    return %arg0, %c0_i32, %arg1 : i32, i32, i32
  }
  func.func @transform_1(%arg0: i32, %arg1: i32) -> (i32, i32) {
    %c0_i32 = arith.constant 0 : i32
    %c0_i32_0 = arith.constant 0 : i32
    %c0_i32_1 = arith.constant 0 : i32
    return %c0_i32, %c0_i32_0 : i32, i32
  }
  func.func @transform_2(%arg0: i32, %arg1: i32) -> (i32, i32) {
    %c0_i32 = arith.constant 0 : i32
    %c0_i32_0 = arith.constant 0 : i32
    %c0_i32_1 = arith.constant 0 : i32
    return %c0_i32, %c0_i32_0 : i32, i32
  }
  func.func @transform_3(%arg0: i32, %arg1: i32) -> (i32, i32, i32) {
    %c0_i32 = arith.constant 0 : i32
    %c0_i32_0 = arith.constant 0 : i32
    return %arg0, %c0_i32, %arg1 : i32, i32, i32
  }
  func.func @transform_4(%arg0: i32, %arg1: i32) -> (i32, i32, i32, i32) {
    %c0_i32 = arith.constant 0 : i32
    %c0_i32_0 = arith.constant 0 : i32
    %c0_i32_1 = arith.constant 0 : i32
    return %arg0, %arg1, %c0_i32, %c0_i32_0 : i32, i32, i32, i32
  }
}

</mosaic_0001>

<bundles_post_ra>
// kernel: vector_quantizer_forward.1
= control target key start
LH: loop header
LB: loop body
LE: loop exit
PB: predicated region body
PF: predicated region fallthrough
CT: control target
= control target key end

     0   :  { %s774_s15 = smov 0   ;;  %s776_s16 = smov 0   ;;  %s852_s0 = inlined_call_operand.vmem [shape: f32[2,4,256], index: 0, kind: input, shape index: {}]   ;;  %s853_s1 = inlined_call_operand.vmem [shape: f32[8,5], index: 1, kind: input, shape index: {}]   ;;  %s854_s2 = inlined_call_operand.vmem [shape: f32[4,8], index: 2, kind: input, shape index: {}]   ;;  %s855_s3 = inlined_call_operand.vmem [shape: f32[2,4,256], index: 3, kind: output, shape index: {0}]   ;;  %s856_s4 = inlined_call_operand.vmem [shape: f32[2,1,8,128], index: 4, kind: output, shape index: {1}]  }
   0x1   :  { %s778_s17 = smov 0  }
   0x2 LB: > { %s27_s18 = sadd.s32 1, %s736_s16  ;;  %p663_p0 = scmp.ge.s32.totalorder %s740_s17, 1  ;;  %s740_s17 = sphi %s778_s17, %s15_s17   ;;  %s736_s16 = sphi %s776_s16, %s858_s16   ;;  %s732_s15 = sphi %s774_s15, %s857_s15  }
   0x3   : > { %p29_p1 = scmp.ge.s32.totalorder %s27_s18, 2  ;;  %p188_p2 = scmp.lt.s32.totalorder %s740_s17, 3 }
   0x5   : > { %s860_s18 = smov (%p29_p1, %s27_s18), 0  ;;  %p189_p3 = pnand %p663_p0, %p188_p2 }
   0x6   : > { %p230_p4 = scmp.lt.s32.totalorder (!%p189_p3), %s732_s15, 1 }
   0x7   : > { %192 = sbr.rel (%p189_p3) target bundleno = 586 (0x24a), region = 32 }
   0xc   : > { %v257_v0 = vld [vmem:[%s853_s1] sm:$0xff]  ;;  %v742_v1 = vmov 1   ;;  %v743_v2 = vmov 0   ;;  %v744_v3 = vmov 2   ;;  %v745_v4 = vmov 4   ;;  %s862_s15 = smov (!%p230_p4, %s732_s15), 1 }
   0xd   : > { %713 = vset.pattern.permute.xlu1 %v742_v1  ;;  %711 = vset.pattern.permute.xlu0 %v743_v2  ;;  %v746_v5 = vmov 3   ;;  %v747_v6 = vmov 0.0   ;;  %v268_v7 = vlaneseq  ;;  %s799_s21 = sshll.u32 %s862_s15, 3  ;;  %vm415_vm12 = vcmask 64512  }
   0xe   : > { %291 = vperm.xlu1 %713, %v257_v0   ;;  %264 = vperm.xlu0 %711, %v257_v0   ;;  %s237_s24 = scalar_lea.vmem %s852_s0, %s799_s21  ;;  %s247_s29 = scalar_lea.vmem %s855_s3, %s799_s21  ;;  %vm516_vm13 = vcmask 1043456  }
   0xf   : > { %483 = vmatprep.mubr.f32.mxu0 %v747_v6  ;;  %v801_v8 = vshrl.u32 %v268_v7, 7  ;;  %v809_v11 = vld [vmem:[%s237_s24] sm:$0xff]  ;;  %s255_s6 = scalar_lea.vmem %s856_s4, %s799_s21 }
  0x11   : > { %v270_v9 = vsub.s32 0, %v801_v8  ;;  %v274_v10 = vsub.s32 4, %v801_v8  ;;  %v296_v12 = vsub.s32 1, %v801_v8  ;;  %v300_v13 = vsub.s32 5, %v801_v8 }
  0x12   : > { %714 = vset.pattern.permute.xlu1 %v744_v3  ;;  %712 = vset.pattern.permute.xlu0 %v745_v4  ;;  %v322_v16 = vsub.s32 2, %v801_v8  ;;  %v326_v17 = vsub.s32 6, %v801_v8  ;;  %v348_v20 = vsub.s32 3, %v801_v8  ;;  %v352_v21 = vsub.s32 7, %v801_v8 }
  0x13   : > { %317 = vperm.xlu1 %714, %v257_v0   ;;  %260 = vperm.xlu0 %712, %v257_v0   ;;  %v271_v14 = vrot.slane %v809_v11, %v270_v9  ;;  %v275_v15 = vrot.slane %v809_v11, %v274_v10  ;;  %v297_v18 = vrot.slane %v809_v11, %v296_v12 }
  0x14   : > { %v301_v19 = vrot.slane %v809_v11, %v300_v13  ;;  %v323_v26 = vrot.slane %v809_v11, %v322_v16  ;;  %v327_v27 = vrot.slane %v809_v11, %v326_v17  ;;  %v349_v30 = vrot.slane %v809_v11, %v348_v20 }
  0x15   : > { %v281_v24 = vrot.slane %v271_v14, %v270_v9  ;;  %v285_v25 = vrot.slane %v275_v15, %v270_v9  ;;  %v307_v28 = vrot.slane %v297_v18, %v296_v12  ;;  %v353_v31 = vrot.slane %v809_v11, %v352_v21  ;;  %v408_v21 = vld [vmem:[%s854_s2] sm:$0xf] }
  0x16   : > { %v311_v29 = vrot.slane %v301_v19, %v296_v12  ;;  %v333_v34 = vrot.slane %v323_v26, %v322_v16  ;;  %v337_v35 = vrot.slane %v327_v27, %v322_v16  ;;  %v359_v42 = vrot.slane %v349_v30, %v348_v20 }
  0x17   : > { %715 = vset.pattern.permute.xlu1 %v746_v5  ;;  %716 = vset.pattern.permute.xlu0 %v746_v5  ;;  %v363_v43 = vrot.slane %v353_v31, %v348_v20 }
  0x18   : > { %343 = vperm.xlu1 %715, %v257_v0  }
  0x89   : > { %v292_v22 = vpop.permute.xlu1 %291  ;;  %v265_v23 = vpop.permute.xlu0 %264 }
  0x8a   : > { %v286_v32 = vmul.f32 %v281_v24, %v265_v23  ;;  %v287_v33 = vmul.f32 %v285_v25, %v265_v23  ;;  %v312_v38 = vmul.f32 %v307_v28, %v292_v22  ;;  %v313_v39 = vmul.f32 %v311_v29, %v292_v22 }
  0x8b   : > { %v748_v22 = vmov 1.0   ;;  %v495_v23 = vcombine.high %v809_v11, %v809_v11 }
  0x8e   : > { %v318_v36 = vpop.permute.xlu1 %317  ;;  %v261_v37 = vpop.permute.xlu0 %260 }
  0x8f   : > { %v288_v40 = vadd.f32 %v286_v32, %v261_v37  ;;  %v289_v41 = vadd.f32 %v287_v33, %v261_v37  ;;  %v338_v44 = vmul.f32 %v333_v34, %v318_v36  ;;  %v339_v45 = vmul.f32 %v337_v35, %v318_v36 }
  0x91   : > { %v314_v46 = vadd.f32 %v312_v38, %v288_v40  ;;  %v315_v47 = vadd.f32 %v313_v39, %v289_v41 }
  0x93   : > { %v344_v48 = vpop.permute.xlu1 %343  ;;  %v340_v49 = vadd.f32 %v338_v44, %v314_v46  ;;  %v341_v50 = vadd.f32 %v339_v45, %v315_v47 }
  0x94   : > { %v364_v51 = vmul.f32 %v359_v42, %v344_v48  ;;  %v365_v52 = vmul.f32 %v363_v43, %v344_v48 }
  0x96   : > { %v366_v53 = vadd.f32 %v364_v51, %v340_v49  ;;  %v367_v54 = vadd.f32 %v365_v52, %v341_v50 }
  0x98   : > { %v370_v55 = vrot.slane %v366_v53, 4  ;;  %v376_v56 = vrot.slane %v367_v54, 4 }
  0x9a   : > { %v371_v57 = vmin.f32 %v366_v53, %v370_v55  ;;  %v377_v58 = vmin.f32 %v367_v54, %v376_v56 }
  0x9c   : > { %v372_v59 = vrot.slane %v371_v57, 2  ;;  %v378_v60 = vrot.slane %v377_v58, 2 }
  0x9e   : > { %v379_v61 = vmin.f32 %v377_v58, %v378_v60  ;;  %v373_v62 = vmin.f32 %v371_v57, %v372_v59 }
  0xa0   : > { %v380_v63 = vrot.slane %v379_v61, 1  ;;  %v374_v0 = vrot.slane %v373_v62, 1 }
  0xa2   : > { %v381_v1 = vmin.f32 %v379_v61, %v380_v63  ;;  %v375_v2 = vmin.f32 %v373_v62, %v374_v0 }
  0xa4   : > { %vm383_vm0 = vcmp.eq.f32.partialorder %v367_v54, %v381_v1  ;;  %vm382_vm1 = vcmp.eq.f32.partialorder %v366_v53, %v375_v2  ;;  %vm405_vm8 = vcmp.lt.f32.partialorder %v381_v1, inf  ;;  %vm404_vm9 = vcmp.lt.f32.partialorder %v375_v2, inf }
  0xa5   : > { %v385_v3 = vsel %vm383_vm0, %v801_v8, 8  ;;  %v384_v4 = vsel %vm382_vm1, %v801_v8, 8 }
  0xa6   : > { %v395_v5 = vrot.slane %v385_v3, 4  ;;  %v386_v6 = vrot.slane %v384_v4, 4 }
  0xa8   : > { %vm396_vm2 = vcmp.lt.s32.totalorder %v385_v3, %v395_v5  ;;  %vm387_vm3 = vcmp.lt.s32.totalorder %v384_v4, %v386_v6 }
  0xa9   : > { %v397_v7 = vsel %vm396_vm2, %v385_v3, %v395_v5  ;;  %v388_v9 = vsel %vm387_vm3, %v384_v4, %v386_v6 }
  0xaa   : > { %v398_v10 = vrot.slane %v397_v7, 2  ;;  %v389_v12 = vrot.slane %v388_v9, 2 }
  0xac   : > { %vm399_vm4 = vcmp.lt.s32.totalorder %v397_v7, %v398_v10  ;;  %vm390_vm5 = vcmp.lt.s32.totalorder %v388_v9, %v389_v12 }
  0xad   : > { %v400_v13 = vsel %vm399_vm4, %v397_v7, %v398_v10  ;;  %v391_v14 = vsel %vm390_vm5, %v388_v9, %v389_v12 }
  0xae   : > { %v401_v15 = vrot.slane %v400_v13, 1  ;;  %v392_v16 = vrot.slane %v391_v14, 1 }
  0xb0   : > { %vm402_vm6 = vcmp.lt.s32.totalorder %v400_v13, %v401_v15  ;;  %vm393_vm7 = vcmp.lt.s32.totalorder %v391_v14, %v392_v16 }
  0xb1   : > { %v403_v17 = vsel %vm402_vm6, %v400_v13, %v401_v15  ;;  %v394_v18 = vsel %vm393_vm7, %v391_v14, %v392_v16 }
  0xb2   : > { %v407_v19 = vsel %vm405_vm8, %v403_v17, 0  ;;  %v406_v20 = vsel %vm404_vm9, %v394_v18, 0 }
  0xb3   : > { %vm410_vm10 = vcmp.eq.s32.totalorder %v801_v8, %v407_v19  ;;  %vm409_vm11 = vcmp.eq.s32.totalorder %v801_v8, %v406_v20 }
  0xb4   : > { %671 = vmatprep.subr.msk.mxu0 %vm410_vm10, %v748_v22 }
  0xb5   : > { %672 = vmatpush1.msk.msra.mxu0 %vm409_vm11, %v748_v22 }
  0xb6   : > { %673 = vmatmul.mubr.msk.f32.vlgmr.msra.gmra.mxu0 %vm415_vm12, %v408_v21 }
 0x176   : > { %v485_v24 = vpop.f32.mrf.mxu0 }
 0x177   : > { %v497_v25 = vsub.f32 %v485_v24, %v809_v11 }
 0x178   : > { %v487_v8 = vpop.f32.mrf.mxu0 }
 0x179   : > { %v508_v26 = vmul.f32 %v497_v25, %v497_v25  ;;  %v492_v27 = vcombine.low %v485_v24, %v487_v8  ;;  %v498_v28 = vsub.f32 %v487_v8, %v495_v23 }
 0x17b   : > { %494 = vst [vmem:[%s247_s29] sm:$0xff] %v492_v27  ;;  %v509_v29 = vmul.f32 %v498_v28, %v498_v28  ;;  %v517_v30 = vsel %vm516_vm13, %v508_v26, 0.0 }
 0x17d   : > { %v518_v31 = vsel %vm516_vm13, %v509_v29, 0.0 }
 0x17e   : > { %v519_v32 = vadd.f32 %v518_v31, %v517_v30 }
 0x180   : > { %520 = vadd.xlane.f32.xlu0 %v519_v32 }
 0x209   : > { %v521_v33 = vpop.xlane.xlu0 %520 }
 0x20a   : > { %v522_v34 = vrot.slane %v521_v33, 4 }
 0x20c   : > { %v523_v35 = vadd.f32 %v522_v34, %v521_v33 }
 0x20e   : > { %v524_v11 = vrot.slane %v523_v35, 2 }
 0x210   : > { %v525_v36 = vadd.f32 %v524_v11, %v523_v35 }
 0x212   : > { %v526_v37 = vrot.slane %v525_v36, 1 }
 0x214   : > { %v527_v38 = vadd.f32 %v526_v37, %v525_v36 }
 0x216   : > { %678 = vpush %v527_v38 }
 0x247   : > { %s679_s7 = spop %678 }
 0x248   : > { %v529_v39 = vstv %s679_s7 }
 0x249   : > { %530 = vst [vmem:[%s255_s6] sm:$0xff] %v529_v39 }
 0x24a PF: > { %s15_s17 = sadd.s32 1, %s740_s17   ;;  %s857_s15 = smov %s736_s16 }
 0x24b   : > { %p12_p5 = scmp.ge.s32.totalorder %s15_s17, 4   ;;  %s858_s16 = smov %s860_s18 }
 0x24d   :  { %14 = sbr.rel (!%p12_p5) target bundleno = 2 (0x2), region = 74 }

</bundles_post_ra>
